<compile_context>
chip_gen: v6e
topology: v6e:2x2x1
jax: 0.10.0
libtpu: 0.0.40
codegen_flags: <defaults>
</compile_context>

<pallas_src>
import jax
import jax.numpy as jnp
from jax import lax
from jax.experimental import pallas as pl
from jax.experimental.pallas import tpu as pltpu

EPS = 1e-5
LANE = 128
MAX_TILE = 512


def _round_up(v, m):
    return ((v + m - 1) // m) * m


def _cdiv(a, b):
    return (a + b - 1) // b


def bn_linear_kernel(x_ref, w_ref, p_ref, o_ref, acc_ref):
    """One (feature-tile j, reduction-tile k) grid step.

    x_ref  : (N,  TK)  activations (f32 or bf16)
    w_ref  : (TK, TN)  W^T tile (f32 or bf16)
    p_ref  : (2,  TN)  stacked [gamma; beta] (f32)
    o_ref  : (N,  TN)  output tile (f32)
    acc_ref: (N,  TN)  f32 VMEM accumulator, persists across k
    """
    k = pl.program_id(1)
    last_k = pl.num_programs(1) - 1

    # Linear partial product on the MXU with f32 accumulation.
    # NOTE: nn.Linear's bias is intentionally absent -- BatchNorm's mean
    # subtraction cancels it exactly, so it cannot affect the output.
    y_part = jnp.dot(x_ref[...], w_ref[...], preferred_element_type=jnp.float32)

    @pl.when(k == 0)
    def _():
        acc_ref[...] = y_part

    @pl.when(k != 0)
    def _():
        acc_ref[...] += y_part

    # Epilogue on the last reduction step: one-pass batch statistics, BN affine
    # folded into a single scale/shift FMA, ReLU, lane-dense store.
    @pl.when(k == last_k)
    def _():
        y = acc_ref[...]                                    # (N, TN) f32
        inv_n = 1.0 / y.shape[0]
        s1 = jnp.sum(y, axis=0, keepdims=True)              # (1, TN)  XLU
        s2 = jnp.sum(y * y, axis=0, keepdims=True)          # (1, TN)  XLU
        mean = s1 * inv_n
        var = jnp.maximum(s2 * inv_n - mean * mean, 0.0)    # clamp f32 cancellation
        p = p_ref[...]                                      # (2, TN)
        scale = p[0:1, :] * lax.rsqrt(var + EPS)            # gamma; rsqrt -> EUP
        shift = p[1:2, :] - mean * scale                    # beta
        o_ref[...] = jnp.maximum(y * scale + shift, 0.0).astype(o_ref.dtype)


def _vmem_budget_bytes():
    """~75% of per-core VMEM: v7x 64 MiB -> 48 MiB, v5e/v6e 128 MiB -> 96 MiB."""
    cap = None
    try:
        cap = int(getattr(pltpu.get_tpu_info(), "vmem_capacity_bytes", 0)) or None
    except Exception:
        cap = None
    if cap is None:
        cap = 64 * 1024 * 1024          # conservative default (v7x per-TC VMEM)
    return min((cap * 3) // 4, 100 * 1024 * 1024)


def _choose_tiles(n, d_in, d_out, x_bytes, w_bytes, budget):
    """Pick (TN feature tile, TK reduction tile, k_tiles)."""
    nblocks = _cdiv(d_out, LANE)
    tn = min(MAX_TILE, nblocks * LANE)
    # Keep >=2 feature tiles when D_out allows it so the "parallel" grid axis
    # can shard across both v7x TensorCores (near-free on 1-TC v5e/v6e).
    if nblocks >= 2 and _cdiv(nblocks * LANE, tn) < 2:
        tn = _cdiv(nblocks, 2) * LANE

    def vmem_need(tn_, tk_, k_tiles_):
        x_bufs = 1 if k_tiles_ == 1 else 2     # x single-buffered when resident
        return (x_bufs * n * tk_ * x_bytes     # x tile(s)
                + 2 * tk_ * tn_ * w_bytes      # W^T tile, double-buffered
                + 2 * 2 * tn_ * 4              # gamma/beta tile, double-buffered
                + 2 * n * tn_ * 4              # output tile, double-buffered
                + n * tn_ * 4)                 # f32 accumulator scratch

    # Prefer keeping the whole reduction dim resident (single K step; x fetched
    # once and reused for every feature tile).
    tk, k_tiles = d_in, 1
    while tn > LANE and vmem_need(tn, tk, k_tiles) > budget:
        tn -= LANE
    if vmem_need(tn, tk, k_tiles) > budget:
        # Large D_in: tile the reduction axis and accumulate in VMEM scratch.
        tk = min(MAX_TILE, _round_up(d_in, LANE))
        while tk > LANE and vmem_need(tn, tk, 2) > budget:
            tk -= LANE
        k_tiles = _cdiv(_round_up(d_in, LANE), tk)
    return tn, tk, k_tiles


def batch_norm_linear(x, w_t, gamma, beta, bias=None, *, compute_dtype=None):
    """Fused Linear -> BatchNorm1d(train) -> ReLU.

    x     : (N, D_in) f32
    w_t   : (D_in, D_out)  nn.Linear weight, transposed
    gamma : (1, D_out)     BatchNorm1d weight
    beta  : (1, D_out)     BatchNorm1d bias
    bias  : nn.Linear bias -- accepted for API parity but never shipped to the
            device (BatchNorm's mean subtraction cancels it exactly).
    compute_dtype : optional, e.g. jnp.bfloat16 -- cast x / W^T for the MXU /
            HBM-streaming path; accumulation and BN epilogue stay f32.
    """
    del bias  # mathematically cancelled by BatchNorm's mean subtraction
    N, D_in = x.shape
    D_out = w_t.shape[1]

    if compute_dtype is not None:
        x = x.astype(compute_dtype)
        w_t = w_t.astype(compute_dtype)
    x_bytes = jnp.dtype(x.dtype).itemsize
    w_bytes = jnp.dtype(w_t.dtype).itemsize

    budget = _vmem_budget_bytes()
    tn, tk, _ = _choose_tiles(N, D_in, D_out, x_bytes, w_bytes, budget)

    d_in_pad = _round_up(D_in, tk)
    k_tiles = d_in_pad // tk
    d_out_pad = _round_up(D_out, tn)
    j_tiles = d_out_pad // tn

    # Pad: zero D_in rows contribute nothing to the dot; zero W^T / gamma /
    # beta columns produce exactly-zero outputs that are sliced off below.
    if d_in_pad != D_in:
        x = jnp.pad(x, ((0, 0), (0, d_in_pad - D_in)))
        w_t = jnp.pad(w_t, ((0, d_in_pad - D_in), (0, 0)))
    params = jnp.concatenate([gamma, beta], axis=0).astype(jnp.float32)  # (2, D_out)
    if d_out_pad != D_out:
        pad = d_out_pad - D_out
        w_t = jnp.pad(w_t, ((0, 0), (0, pad)))
        params = jnp.pad(params, ((0, 0), (0, pad)))

    cost = pl.CostEstimate(
        flops=2 * N * D_in * D_out,
        transcendentals=D_out,                 # one rsqrt per output feature
        bytes_accessed=(x_bytes * N * d_in_pad * (1 if k_tiles == 1 else j_tiles)
                        + w_bytes * d_in_pad * d_out_pad
                        + 4 * 2 * d_out_pad
                        + 4 * N * d_out_pad),
    )
    compiler_params = pltpu.CompilerParams(
        dimension_semantics=("parallel", "arbitrary"),
        vmem_limit_bytes=int(budget),
    )

    def build(x_pipeline_mode):
        x_kwargs = {}
        if x_pipeline_mode is not None:
            x_kwargs["pipeline_mode"] = x_pipeline_mode
        return pl.pallas_call(
            bn_linear_kernel,
            out_shape=jax.ShapeDtypeStruct((N, d_out_pad), jnp.float32),
            grid_spec=pltpu.PrefetchScalarGridSpec(
                num_scalar_prefetch=0,
                grid=(j_tiles, k_tiles),
                in_specs=[
                    pl.BlockSpec((N, tk), lambda j, k: (0, k), **x_kwargs),
                    pl.BlockSpec((tk, tn), lambda j, k: (k, j)),
                    pl.BlockSpec((2, tn), lambda j, k: (0, j)),
                ],
                out_specs=pl.BlockSpec((N, tn), lambda j, k: (0, j)),
                scratch_shapes=[pltpu.VMEM((N, tn), jnp.float32)],
            ),
            compiler_params=compiler_params,
            cost_estimate=cost,
        )

    # x's index_map is constant when the reduction dim is un-tiled, so it is
    # fetched once; single-buffer it so it occupies 1x (not 2x) N*D_in of VMEM.
    x_mode = pl.Buffered(1) if k_tiles == 1 else None
    try:
        out = build(x_mode)(x, w_t, params)
    except Exception:
        if x_mode is None:
            raise
        out = build(None)(x, w_t, params)  # fallback: default double-buffering

    if d_out_pad != D_out:
        out = out[:, :D_out]
    return out


def reference(x, w_t, b, gamma, beta):
    y = x @ w_t + b
    mean = y.mean(axis=0, keepdims=True)
    var = ((y - mean) ** 2).mean(axis=0, keepdims=True)   # biased (training BN)
    y_hat = (y - mean) / jnp.sqrt(var + EPS)
    return jnp.maximum(gamma * y_hat + beta, 0.0)


def _make_inputs(key, N, D_in, D_out):
    kx, kw, kb, kg, kbt = jax.random.split(key, 5)
    x = jax.random.normal(kx, (N, D_in), dtype=jnp.float32)
    bound = 1.0 / (D_in ** 0.5)
    w = jax.random.uniform(kw, (D_out, D_in), minval=-bound, maxval=bound,
                           dtype=jnp.float32)            # nn.Linear weight (out, in)
    b = jax.random.uniform(kb, (1, D_out), minval=-bound, maxval=bound,
                           dtype=jnp.float32)            # nn.Linear bias
    gamma = 1.0 + 0.1 * jax.random.normal(kg, (1, D_out), dtype=jnp.float32)
    beta = 0.1 * jax.random.normal(kbt, (1, D_out), dtype=jnp.float32)
    return x, w.T, b, gamma, beta


def _run_case(key, N, D_in, D_out, *, compute_dtype=None, atol=1e-4, rtol=1e-4):
    x, w_t, b, gamma, beta = _make_inputs(key, N, D_in, D_out)
    out = jax.block_until_ready(
        batch_norm_linear(x, w_t, gamma, beta, bias=b, compute_dtype=compute_dtype))
    if compute_dtype is not None:
        # Compare against a reference fed the same rounded inputs.
        x_r = x.astype(compute_dtype).astype(jnp.float32)
        w_r = w_t.astype(compute_dtype).astype(jnp.float32)
    else:
        x_r, w_r = x, w_t
    ref = reference(x_r, w_r, b, gamma, beta)   # bias included: cancelled by BN
    assert out.shape == (N, D_out)
    assert jnp.allclose(out, ref, atol=atol, rtol=rtol), (
        f"mismatch vs reference for ({N},{D_in},{D_out},{compute_dtype})")


if __name__ == "__main__":
    key = jax.random.PRNGKey(0)
    k1, k2, k3 = jax.random.split(key, 3)

    # Lane-aligned: D_out=256 -> two 128-wide feature tiles (parallel axis for
    # v7x megacore), un-tiled reduction (single-buffered resident x).
    _run_case(k1, N=8, D_in=128, D_out=256)

    # Unaligned toy layer (like the module's 32->64): pad-to-128 / slice path.
    _run_case(k2, N=8, D_in=32, D_out=64)

    # bf16 streaming path (halves HBM weight traffic); BN epilogue stays f32.
    # Compared against a reference running on the same bf16-rounded inputs.
    _run_case(k3, N=8, D_in=128, D_out=256,
              compute_dtype=jnp.bfloat16, atol=1e-2, rtol=1e-2)

    print("KERNEL_OK")
</pallas_src>

<mosaic_0001>
module attributes {stable_mosaic.version = 11 : i64} {
  func.func @bn_linear_kernel(%arg0: i32, %arg1: i32, %arg2: memref<8x128xf32, #tpu.memory_space<vmem>>, %arg3: memref<128x128xf32, #tpu.memory_space<vmem>>, %arg4: memref<2x128xf32, #tpu.memory_space<vmem>>, %arg5: memref<8x128xf32, #tpu.memory_space<vmem>>, %arg6: memref<8x128xf32, #tpu.memory_space<vmem>>) attributes {dimension_semantics = [#tpu.dimension_semantics<parallel>, #tpu.dimension_semantics<arbitrary>], iteration_bounds = array<i64: 2, 1>, scalar_prefetch = 0 : i64, scratch_operands = 1 : i64, tpu.core_type = #tpu.core_type<tc>, window_params = [{pipeline_mode = #tpu.pipeline_mode<synchronous>, transform_indices = @transform_0, window_bounds = array<i64: 8, 128>}, {transform_indices = @transform_1, window_bounds = array<i64: 128, 128>}, {transform_indices = @transform_2, window_bounds = array<i64: 2, 128>}, {transform_indices = @transform_3, window_bounds = array<i64: 8, 128>}]} {
    %c0 = arith.constant 0 : index
    %c0_0 = arith.constant 0 : index
    %0 = vector.load %arg2[%c0, %c0_0] : memref<8x128xf32, #tpu.memory_space<vmem>>, vector<8x128xf32>
    %c0_1 = arith.constant 0 : index
    %c0_2 = arith.constant 0 : index
    %1 = vector.load %arg3[%c0_1, %c0_2] : memref<128x128xf32, #tpu.memory_space<vmem>>, vector<128x128xf32>
    %cst = arith.constant dense<0.000000e+00> : vector<8x128xf32>
    %2 = tpu.matmul %0, %1, %cst {dimension_numbers = #tpu.dot_dimension_numbers<[1], [0], [0], [1], [0, 0, 1, 1], [], []>} : vector<8x128xf32>, vector<128x128xf32>, vector<8x128xf32> -> vector<8x128xf32>
    %c0_i32 = arith.constant 0 : i32
    %3 = arith.cmpi eq, %arg1, %c0_i32 : i32
    %4 = arith.extui %3 : i1 to i32
    %c0_i32_3 = arith.constant 0 : i32
    %5 = arith.cmpi ne, %4, %c0_i32_3 : i32
    scf.if %5 {
      %c0_8 = arith.constant 0 : index
      %c0_9 = arith.constant 0 : index
      %12 = vector.load %arg6[%c0_8, %c0_9] : memref<8x128xf32, #tpu.memory_space<vmem>>, vector<8x128xf32>
      tpu.vector_store %arg6[%c0_8, %c0_9], %2 {strides = array<i32>} : memref<8x128xf32, #tpu.memory_space<vmem>>, vector<8x128xf32>,
    } else {
    }
    %c0_i32_4 = arith.constant 0 : i32
    %6 = arith.cmpi ne, %arg1, %c0_i32_4 : i32
    %7 = arith.extui %6 : i1 to i32
    %c0_i32_5 = arith.constant 0 : i32
    %8 = arith.cmpi ne, %7, %c0_i32_5 : i32
    scf.if %8 {
      %c0_8 = arith.constant 0 : index
      %c0_9 = arith.constant 0 : index
      %12 = vector.load %arg6[%c0_8, %c0_9] : memref<8x128xf32, #tpu.memory_space<vmem>>, vector<8x128xf32>
      %13 = arith.addf %12, %2 : vector<8x128xf32>
      %c0_10 = arith.constant 0 : index
      %c0_11 = arith.constant 0 : index
      %14 = vector.load %arg6[%c0_10, %c0_11] : memref<8x128xf32, #tpu.memory_space<vmem>>, vector<8x128xf32>
      tpu.vector_store %arg6[%c0_10, %c0_11], %13 {strides = array<i32>} : memref<8x128xf32, #tpu.memory_space<vmem>>, vector<8x128xf32>,
    } else {
    }
    %c0_i32_6 = arith.constant 0 : i32
    %9 = arith.cmpi eq, %arg1, %c0_i32_6 : i32
    %10 = arith.extui %9 : i1 to i32
    %c0_i32_7 = arith.constant 0 : i32
    %11 = arith.cmpi ne, %10, %c0_i32_7 : i32
    scf.if %11 {
      %c0_8 = arith.constant 0 : index
      %c0_9 = arith.constant 0 : index
      %12 = vector.load %arg6[%c0_8, %c0_9] : memref<8x128xf32, #tpu.memory_space<vmem>>, vector<8x128xf32>
      %cst_10 = arith.constant dense<0.000000e+00> : vector<128xf32>
      %13 = vector.multi_reduction <add>, %12, %cst_10 [0] : vector<8x128xf32> to vector<128xf32>
      %14 = vector.shape_cast %13 : vector<128xf32> to vector<1x128xf32>
      %15 = arith.mulf %12, %12 : vector<8x128xf32>
      %cst_11 = arith.constant dense<0.000000e+00> : vector<128xf32>
      %16 = vector.multi_reduction <add>, %15, %cst_11 [0] : vector<8x128xf32> to vector<128xf32>
      %17 = vector.shape_cast %16 : vector<128xf32> to vector<1x128xf32>
      %cst_12 = arith.constant 1.250000e-01 : f32
      %18 = vector.broadcast %cst_12 : f32 to vector<1x128xf32>
      %19 = arith.mulf %14, %18 : vector<1x128xf32>
      %cst_13 = arith.constant 1.250000e-01 : f32
      %20 = vector.broadcast %cst_13 : f32 to vector<1x128xf32>
      %21 = arith.mulf %17, %20 : vector<1x128xf32>
      %22 = arith.mulf %19, %19 : vector<1x128xf32>
      %23 = arith.subf %21, %22 : vector<1x128xf32>
      %cst_14 = arith.constant 0.000000e+00 : f32
      %24 = vector.broadcast %cst_14 : f32 to vector<1x128xf32>
      %25 = arith.maximumf %23, %24 : vector<1x128xf32>
      %c0_15 = arith.constant 0 : index
      %c0_16 = arith.constant 0 : index
      %26 = vector.load %arg4[%c0_15, %c0_16] : memref<2x128xf32, #tpu.memory_space<vmem>>, vector<2x128xf32>
      %27 = vector.extract_strided_slice %26 {offsets = [0, 0], sizes = [1, 128], strides = [1, 1]} : vector<2x128xf32> to vector<1x128xf32>
      %cst_17 = arith.constant 9.99999974E-6 : f32
      %28 = vector.broadcast %cst_17 : f32 to vector<1x128xf32>
      %29 = arith.addf %25, %28 : vector<1x128xf32>
      %30 = math.rsqrt %29 : vector<1x128xf32>
      %31 = arith.mulf %27, %30 : vector<1x128xf32>
      %32 = vector.extract_strided_slice %26 {offsets = [1, 0], sizes = [1, 128], strides = [1, 1]} : vector<2x128xf32> to vector<1x128xf32>
      %33 = arith.mulf %19, %31 : vector<1x128xf32>
      %34 = arith.subf %32, %33 : vector<1x128xf32>
      %35 = vector.broadcast %31 : vector<1x128xf32> to vector<8x128xf32>
      %36 = arith.mulf %12, %35 : vector<8x128xf32>
      %37 = vector.broadcast %34 : vector<1x128xf32> to vector<8x128xf32>
      %38 = arith.addf %36, %37 : vector<8x128xf32>
      %cst_18 = arith.constant 0.000000e+00 : f32
      %39 = vector.broadcast %cst_18 : f32 to vector<8x128xf32>
      %40 = arith.maximumf %38, %39 : vector<8x128xf32>
      %c0_19 = arith.constant 0 : index
      %c0_20 = arith.constant 0 : index
      %41 = vector.load %arg5[%c0_19, %c0_20] : memref<8x128xf32, #tpu.memory_space<vmem>>, vector<8x128xf32>
      tpu.vector_store %arg5[%c0_19, %c0_20], %40 {strides = array<i32>} : memref<8x128xf32, #tpu.memory_space<vmem>>, vector<8x128xf32>,
    } else {
    }
    return
  }
  func.func @transform_0(%arg0: i32, %arg1: i32) -> (i32, i32) {
    %c0_i32 = arith.constant 0 : i32
    %c0_i32_0 = arith.constant 0 : i32
    return %c0_i32, %arg1 : i32, i32
  }
  func.func @transform_1(%arg0: i32, %arg1: i32) -> (i32, i32) {
    %c0_i32 = arith.constant 0 : i32
    return %arg1, %arg0 : i32, i32
  }
  func.func @transform_2(%arg0: i32, %arg1: i32) -> (i32, i32) {
    %c0_i32 = arith.constant 0 : i32
    %c0_i32_0 = arith.constant 0 : i32
    return %c0_i32, %arg0 : i32, i32
  }
  func.func @transform_3(%arg0: i32, %arg1: i32) -> (i32, i32) {
    %c0_i32 = arith.constant 0 : i32
    %c0_i32_0 = arith.constant 0 : i32
    return %c0_i32, %arg0 : i32, i32
  }
}

module attributes {stable_mosaic.version = 11 : i64} {
  func.func @bn_linear_kernel(%arg0: i32, %arg1: i32, %arg2: memref<8x128xf32, #tpu.memory_space<vmem>>, %arg3: memref<128x128xf32, #tpu.memory_space<vmem>>, %arg4: memref<2x128xf32, #tpu.memory_space<vmem>>, %arg5: memref<8x128xf32, #tpu.memory_space<vmem>>, %arg6: memref<8x128xf32, #tpu.memory_space<vmem>>) attributes {dimension_semantics = [#tpu.dimension_semantics<parallel>, #tpu.dimension_semantics<arbitrary>], iteration_bounds = array<i64: 2, 1>, scalar_prefetch = 0 : i64, scratch_operands = 1 : i64, tpu.core_type = #tpu.core_type<tc>, window_params = [{transform_indices = @transform_0, window_bounds = array<i64: 8, 128>}, {transform_indices = @transform_1, window_bounds = array<i64: 128, 128>}, {transform_indices = @transform_2, window_bounds = array<i64: 2, 128>}, {transform_indices = @transform_3, window_bounds = array<i64: 8, 128>}]} {
    %c0 = arith.constant 0 : index
    %c0_0 = arith.constant 0 : index
    %0 = vector.load %arg2[%c0, %c0_0] : memref<8x128xf32, #tpu.memory_space<vmem>>, vector<8x128xf32>
    %c0_1 = arith.constant 0 : index
    %c0_2 = arith.constant 0 : index
    %1 = vector.load %arg3[%c0_1, %c0_2] : memref<128x128xf32, #tpu.memory_space<vmem>>, vector<128x128xf32>
    %cst = arith.constant dense<0.000000e+00> : vector<8x128xf32>
    %2 = tpu.matmul %0, %1, %cst {dimension_numbers = #tpu.dot_dimension_numbers<[1], [0], [0], [1], [0, 0, 1, 1], [], []>} : vector<8x128xf32>, vector<128x128xf32>, vector<8x128xf32> -> vector<8x128xf32>
    %c0_i32 = arith.constant 0 : i32
    %3 = arith.cmpi eq, %arg1, %c0_i32 : i32
    %4 = arith.extui %3 : i1 to i32
    %c0_i32_3 = arith.constant 0 : i32
    %5 = arith.cmpi ne, %4, %c0_i32_3 : i32
    scf.if %5 {
      %c0_8 = arith.constant 0 : index
      %c0_9 = arith.constant 0 : index
      %12 = vector.load %arg6[%c0_8, %c0_9] : memref<8x128xf32, #tpu.memory_space<vmem>>, vector<8x128xf32>
      tpu.vector_store %arg6[%c0_8, %c0_9], %2 {strides = array<i32>} : memref<8x128xf32, #tpu.memory_space<vmem>>, vector<8x128xf32>,
    } else {
    }
    %c0_i32_4 = arith.constant 0 : i32
    %6 = arith.cmpi ne, %arg1, %c0_i32_4 : i32
    %7 = arith.extui %6 : i1 to i32
    %c0_i32_5 = arith.constant 0 : i32
    %8 = arith.cmpi ne, %7, %c0_i32_5 : i32
    scf.if %8 {
      %c0_8 = arith.constant 0 : index
      %c0_9 = arith.constant 0 : index
      %12 = vector.load %arg6[%c0_8, %c0_9] : memref<8x128xf32, #tpu.memory_space<vmem>>, vector<8x128xf32>
      %13 = arith.addf %12, %2 : vector<8x128xf32>
      %c0_10 = arith.constant 0 : index
      %c0_11 = arith.constant 0 : index
      %14 = vector.load %arg6[%c0_10, %c0_11] : memref<8x128xf32, #tpu.memory_space<vmem>>, vector<8x128xf32>
      tpu.vector_store %arg6[%c0_10, %c0_11], %13 {strides = array<i32>} : memref<8x128xf32, #tpu.memory_space<vmem>>, vector<8x128xf32>,
    } else {
    }
    %c0_i32_6 = arith.constant 0 : i32
    %9 = arith.cmpi eq, %arg1, %c0_i32_6 : i32
    %10 = arith.extui %9 : i1 to i32
    %c0_i32_7 = arith.constant 0 : i32
    %11 = arith.cmpi ne, %10, %c0_i32_7 : i32
    scf.if %11 {
      %c0_8 = arith.constant 0 : index
      %c0_9 = arith.constant 0 : index
      %12 = vector.load %arg6[%c0_8, %c0_9] : memref<8x128xf32, #tpu.memory_space<vmem>>, vector<8x128xf32>
      %cst_10 = arith.constant dense<0.000000e+00> : vector<128xf32>
      %13 = vector.multi_reduction <add>, %12, %cst_10 [0] : vector<8x128xf32> to vector<128xf32>
      %14 = vector.shape_cast %13 : vector<128xf32> to vector<1x128xf32>
      %15 = arith.mulf %12, %12 : vector<8x128xf32>
      %cst_11 = arith.constant dense<0.000000e+00> : vector<128xf32>
      %16 = vector.multi_reduction <add>, %15, %cst_11 [0] : vector<8x128xf32> to vector<128xf32>
      %17 = vector.shape_cast %16 : vector<128xf32> to vector<1x128xf32>
      %cst_12 = arith.constant 1.250000e-01 : f32
      %18 = vector.broadcast %cst_12 : f32 to vector<1x128xf32>
      %19 = arith.mulf %14, %18 : vector<1x128xf32>
      %cst_13 = arith.constant 1.250000e-01 : f32
      %20 = vector.broadcast %cst_13 : f32 to vector<1x128xf32>
      %21 = arith.mulf %17, %20 : vector<1x128xf32>
      %22 = arith.mulf %19, %19 : vector<1x128xf32>
      %23 = arith.subf %21, %22 : vector<1x128xf32>
      %cst_14 = arith.constant 0.000000e+00 : f32
      %24 = vector.broadcast %cst_14 : f32 to vector<1x128xf32>
      %25 = arith.maximumf %23, %24 : vector<1x128xf32>
      %c0_15 = arith.constant 0 : index
      %c0_16 = arith.constant 0 : index
      %26 = vector.load %arg4[%c0_15, %c0_16] : memref<2x128xf32, #tpu.memory_space<vmem>>, vector<2x128xf32>
      %27 = vector.extract_strided_slice %26 {offsets = [0, 0], sizes = [1, 128], strides = [1, 1]} : vector<2x128xf32> to vector<1x128xf32>
      %cst_17 = arith.constant 9.99999974E-6 : f32
      %28 = vector.broadcast %cst_17 : f32 to vector<1x128xf32>
      %29 = arith.addf %25, %28 : vector<1x128xf32>
      %30 = math.rsqrt %29 : vector<1x128xf32>
      %31 = arith.mulf %27, %30 : vector<1x128xf32>
      %32 = vector.extract_strided_slice %26 {offsets = [1, 0], sizes = [1, 128], strides = [1, 1]} : vector<2x128xf32> to vector<1x128xf32>
      %33 = arith.mulf %19, %31 : vector<1x128xf32>
      %34 = arith.subf %32, %33 : vector<1x128xf32>
      %35 = vector.broadcast %31 : vector<1x128xf32> to vector<8x128xf32>
      %36 = arith.mulf %12, %35 : vector<8x128xf32>
      %37 = vector.broadcast %34 : vector<1x128xf32> to vector<8x128xf32>
      %38 = arith.addf %36, %37 : vector<8x128xf32>
      %cst_18 = arith.constant 0.000000e+00 : f32
      %39 = vector.broadcast %cst_18 : f32 to vector<8x128xf32>
      %40 = arith.maximumf %38, %39 : vector<8x128xf32>
      %c0_19 = arith.constant 0 : index
      %c0_20 = arith.constant 0 : index
      %41 = vector.load %arg5[%c0_19, %c0_20] : memref<8x128xf32, #tpu.memory_space<vmem>>, vector<8x128xf32>
      tpu.vector_store %arg5[%c0_19, %c0_20], %40 {strides = array<i32>} : memref<8x128xf32, #tpu.memory_space<vmem>>, vector<8x128xf32>,
    } else {
    }
    return
  }
  func.func @transform_0(%arg0: i32, %arg1: i32) -> (i32, i32) {
    %c0_i32 = arith.constant 0 : i32
    %c0_i32_0 = arith.constant 0 : i32
    return %c0_i32, %arg1 : i32, i32
  }
  func.func @transform_1(%arg0: i32, %arg1: i32) -> (i32, i32) {
    %c0_i32 = arith.constant 0 : i32
    return %arg1, %arg0 : i32, i32
  }
  func.func @transform_2(%arg0: i32, %arg1: i32) -> (i32, i32) {
    %c0_i32 = arith.constant 0 : i32
    %c0_i32_0 = arith.constant 0 : i32
    return %c0_i32, %arg0 : i32, i32
  }
  func.func @transform_3(%arg0: i32, %arg1: i32) -> (i32, i32) {
    %c0_i32 = arith.constant 0 : i32
    %c0_i32_0 = arith.constant 0 : i32
    return %c0_i32, %arg0 : i32, i32
  }
}

</mosaic_0001>

<bundles_post_ra>
// kernel: tpu_custom_call.1
= control target key start
LH: loop header
LB: loop body
LE: loop exit
PB: predicated region body
PF: predicated region fallthrough
CT: control target
= control target key end

     0   :  { %s1091_s0 = inlined_call_operand.hbm [shape: f32[8,128], index: 0, kind: input, shape index: {}]   ;;  %s1092_s1 = inlined_call_operand.hbm [shape: f32[128,256], index: 1, kind: input, shape index: {}]   ;;  %s1093_s2 = inlined_call_operand.hbm [shape: f32[2,256], index: 2, kind: input, shape index: {}]   ;;  %s1094_s3 = inlined_call_operand.hbm [shape: f32[8,256], index: 3, kind: output, shape index: {}]  }
   0x1   :  { %1098 = sst [smem:[#allocation13_spill]] %s1092_s1 }
   0x2   :  { %8 = vsyncpa [#allocation4], 0 }
   0x3   :  { %9 = vsyncpa [#allocation7], 0 }
   0x4   :  { %11 = vsyncpa [#allocation7 + $0x1], 0 }
   0x5   :  { %12 = vsyncpa [#allocation5], 0 }
   0x6   :  { %14 = vsyncpa [#allocation5 + $0x1], 0  ;;  %s882_s12 = smov 0   ;;  %s884_s13 = smov 0  }
   0x7   :  { %s886_s14 = smov 0   ;;  %s888_s15 = smov 0  }
   0x8   :  { %s890_s16 = smov 0   ;;  %s892_s17 = smov 0  }
   0x9 LB: > { %s32_s18 = sadd.s32 1, %s847_s16  ;;  %s67_s19 = sadd.s32 1, %s839_s14  ;;  %s851_s17 = sphi %s892_s17, %s20_s17   ;;  %s847_s16 = sphi %s890_s16, %s1116_s16   ;;  %s843_s15 = sphi %s888_s15, %s1115_s15   ;;  %s839_s14 = sphi %s886_s14, %s1114_s14   ;;  %s835_s13 = sphi %s884_s13, %s1113_s13   ;;  %s831_s12 = sphi %s882_s12, %s1112_s12  }
   0xa   : > { %p34_p0 = scmp.ge.s32.totalorder %s32_s18, 2  ;;  %p74_p1 = scmp.ne.s32.totalorder %s839_s14, %s835_s13 }
   0xb   : > { %p75_p2 = scmp.eq.s32.totalorder %s851_s17, 0  ;;  %p626_p5 = scmp.lt.s32.totalorder %s851_s17, 2 }
   0xc   : > { %s1118_s18 = smov (%p34_p0, %s32_s18), 0  ;;  %s169_s21 = sand.u32 1, %s851_s17  }
   0xd   : > { %p76_p4 = por %p75_p2, %p74_p1  ;;  %s63_s20 = ssub.s32 %s847_s16, %s1118_s18 }
   0xe   : > { %p65_p6 = scmp.eq.s32.totalorder %s63_s20, 0  ;;  %s171_s22 = sand.u32 1, %s839_s14  }
   0xf   : > { %s536_s23 = sshll.u32 %s847_s16, 7  ;;  %s535_s25 = sshll.u32 %s171_s22, 7 }
  0x10   : > { %s930_s24 = scalar_select %p65_p6, %s839_s14, %s67_s19  }
  0x11   : > { %s1099_s1 = sld [smem:[#allocation13_spill]]  ;;  %p937_p7 = pnand %p626_p5, %p76_p4 }
  0x12   : > { %s173_s30 = scalar_lea.vmem [#allocation6], %s535_s25  ;;  %s941_s5 = scalar_lea.sflag [#allocation7], %s169_s21 }
  0x13   : > { %s182_s4 = sshll.u32 %s173_s30, 4  ;;  %p687_p8 = pneg %p937_p7  ;;  %s183_s4 = int_to_ptr.vmem [resolvable:$true] %s182_s4 }
  0x14   : > { %s698_s6 = scalar_lea.vmem %s183_s4, 2048  ;;  %s853_s7 = smov [#allocation6]  }
  0x15   : > { %p699_p9 = scmp.ne.s32.totalorder %s183_s4, %s698_s6  ;;  %s703_s8 = sshll.u32 %s853_s7, 4  ;;  %s704_s8 = int_to_ptr.vmem [resolvable:$false] %s703_s8 }
  0x16   : > { %s705_s9 = scalar_lea.vmem %s704_s8, 4096  ;;  %p706_p12 = scmp.lt.s32.totalorder %s183_s4, %s704_s8 }
  0x17   : > { %s181_s28 = scalar_lea.hbm %s1099_s1, %s536_s23  ;;  %p701_p10 = pnand %p699_p9, %p687_p8 }
  0x18   : > { %p707_p13 = scmp.lt.s32.totalorder %s705_s9, %s698_s6 }
  0x19   : > { %p702_p11 = pneg %p701_p10 }
  0x1a   : > { %p708_p0 = por %p707_p13, %p706_p12 }
  0x1c   : > { %p709_p2 = pnand %p708_p0, %p702_p11 }
  0x1e   : > { %712 = shalt.err (!%p709_p2)
}
  0x1f   : > { %s854_s10 = smov 256   ;;  %s855_s11 = smov 128  }
  0x20   : > { %s856_s19 = smov 8   ;;  %s952_s20 = sadd.s32 4294967295, %s851_s17  }
  0x21   : > { %617 = dma.hbm_to_vmem [thread:$0]  (!%p937_p7), %s181_s28, 2048, %s183_s4, %s941_s5, %s854_s10, %s855_s11, %s856_s19  }
  0x22   : > { %s531_s21 = sadd.s32 4294967294, %s851_s17   ;;  %p80_p4 = scmp.ne.s32.totalorder %s835_s13, %s831_s12 }
  0x23   : > { %p1096_p5 = scmp.eq.s32.totalorder %s952_s20, 0  ;;  %p130_p6 = scmp.eq.s32.totalorder %s952_s20, 1 }
  0x24   : > { %p136_p9 = scmp.eq.s32.totalorder %s531_s21, 1  ;;  %p532_p11 = scmp.ge.s32.totalorder %s851_s17, 1 }
  0x25   : > { %p961_p10 = por %p1096_p5, %p80_p4  ;;  %p969_p12 = por %p130_p6, %p74_p1 }
  0x26   : > { %p973_p13 = por %p136_p9, %p80_p4  ;;  %p143_p0 = scmp.lt.s32.totalorder %s851_s17, 3 }
  0x27   : > { %s1101_s23 = scalar_select %p961_p10, 1, 0 }
  0x28   : > { %s1102_s25 = scalar_select %p969_p12, 1, 0 }
  0x29   : > { %s1103_s26 = scalar_select %p973_p13, 1, 0 }
  0x2a   : > { %s537_s27 = sshll.u32 %s171_s22, 1  ;;  %p980_p2 = pnand %p532_p11, %p143_p0 }
  0x2b   : > { %s857_s30 = smov [#allocation3]   ;;  %s538_s6 = sshll.u32 %s847_s16, 5 }
  0x2c   : > { %s158_s4 = sshll.u32 %s857_s30, 4  ;;  %p610_p1 = pneg %p980_p2  ;;  %s984_s4 = int_to_ptr.vmem [resolvable:$true] %s158_s4 }
  0x2d   : > { %s201_s9 = scalar_lea.hbm %s1093_s2, %s538_s6  ;;  %s196_s10 = scalar_lea.vmem [#allocation8], %s537_s27 }
  0x2e   : > { %s203_s11 = sshll.u32 %s196_s10, 4  ;;  %p994_p4 = pnand %p610_p1, %p1096_p5  ;;  %s204_s11 = int_to_ptr.vmem [resolvable:$true] %s203_s11 }
  0x2f   : > { %s726_s19 = scalar_lea.vmem %s204_s11, 32  ;;  %s858_s21 = smov [#allocation8]  }
  0x30   : > { %p727_p6 = scmp.ne.s32.totalorder %s204_s11, %s726_s19  ;;  %s731_s30 = sshll.u32 %s858_s21, 4  ;;  %s732_s30 = int_to_ptr.vmem [resolvable:$false] %s731_s30 }
  0x31   : > { %s733_s1 = scalar_lea.vmem %s732_s30, 64  ;;  %p734_p0 = scmp.lt.s32.totalorder %s204_s11, %s732_s30 }
  0x32   : > { %p729_p9 = pnand %p727_p6, %p687_p8  ;;  %p735_p3 = scmp.lt.s32.totalorder %s733_s1, %s726_s19 }
  0x34   : > { %p730_p11 = pneg %p729_p9  ;;  %p736_p13 = por %p735_p3, %p734_p0 }
  0x36   : > { %p737_p12 = pnand %p736_p13, %p730_p11 }
  0x38   : > { %740 = shalt.err (!%p737_p12)
}
  0x39   : > { %620 = dma.hbm_to_vmem [thread:$0]  (!%p937_p7), %s201_s9, 32, %s204_s11, %s941_s5  }
  0x3a   : > { %p743_p8 = pneg %p994_p4  ;;  %s752_s27 = scalar_lea.vmem %s984_s4, 128 }
  0x3b   : > { %p753_p1 = scmp.ne.s32.totalorder %s984_s4, %s752_s27  ;;  %p760_p5 = scmp.lt.s32.totalorder %s984_s4, %s984_s4 }
  0x3c   : > { %p761_p10 = scmp.lt.s32.totalorder %s752_s27, %s752_s27 }
  0x3d   : > { %p755_p6 = pnand %p753_p1, %p743_p8 }
  0x3e   : > { %p762_p3 = por %p761_p10, %p760_p5 }
  0x3f   : > { %p756_p9 = pneg %p755_p6 }
  0x41   : > { %p763_p13 = pnand %p762_p3, %p756_p9 }
  0x43   : > { %766 = shalt.err (!%p763_p13)
}
  0x44   : > { %613 = dma.hbm_to_vmem [thread:$0]  (!%p994_p4), %s1091_s0, 128, %s984_s4, [#allocation4]  }
  0x45   : > { %212 = sbr.rel (%p980_p2) target bundleno = 369 (0x171), region = 32  ;;  %p1106_p7 = scmp.eq.s32.totalorder (!%p980_p2), %s952_s20, 0 }
  0x4a   : > { %818 = dma.done.wait (%p1106_p7), [#allocation4], 128   ;;  %p1107_p12 = pmov %p1106_p7 }
  0x4b   : > { %s218_s5 = sand.u32 1, %s952_s20   ;;  %s1024_s6 = sand.u32 1, %s835_s13  }
  0x4c   : > { %820 = vsyncadd (%p1107_p12), [#allocation4], 4294967168  ;;  %s541_s7 = sshll.u32 %s1024_s6, 7  ;;  %s219_s8 = scalar_lea.sflag [#allocation7], %s218_s5 }
  0x4d   : > { %s1027_s9 = scalar_lea.vmem [#allocation6], %s541_s7  ;;  %p1108_p5 = scmp.ne.s32.totalorder %s1101_s23, 0 }
  0x4f   : > { %822 = dma.done.wait (%p1108_p5), %s219_s8, 2080  }
  0x50   : > { %824 = vsyncadd (%p1108_p5), %s219_s8, 4294965216  ;;  %v859_v0 = vmov 0.0   ;;  %vm860_vm0 = vmmov 0   ;;  %v276_v1 = vld [vmem:[%s1027_s9 + $0x78] sm:$0xff]  ;;  %v275_v2 = vld [vmem:[%s1027_s9 + $0x70] sm:$0xff]  ;;  %s542_s20 = sshll.u32 %s1024_s6, 1  ;;  %v390_v39 = vlaneseq }
  0x51   : > { %565 = vmatprep.subr.mxu0 %v859_v0  ;;  %597 = vmatprep.mubr.msk.f32.mxu0 %vm860_vm0, %v859_v0  ;;  %v274_v3 = vld [vmem:[%s1027_s9 + $0x68] sm:$0xff]  ;;  %v273_v4 = vld [vmem:[%s1027_s9 + $0x60] sm:$0xff]  ;;  %v272_v5 = vld [vmem:[%s1027_s9 + $0x58] sm:$0xff]  ;;  %s231_s23 = scalar_lea.vmem [#allocation8], %s542_s20  ;;  %s543_s28 = sshll.u32 %s1024_s6, 3 }
  0x52   : > { %566 = vmatpush3.msra.mxu0 %v276_v1  ;;  %v271_v6 = vld [vmem:[%s1027_s9 + $0x50] sm:$0xff]  ;;  %v270_v7 = vld [vmem:[%s1027_s9 + $0x48] sm:$0xff]  ;;  %v269_v8 = vld [vmem:[%s1027_s9 + $0x40] sm:$0xff]  ;;  %v391_v40 = vshrl.u32 %v390_v39, 7  ;;  %s545_s4 = sshll.u32 %s843_s15, 7  ;;  %s258_s10 = scalar_lea.vmem [#allocation9], %s543_s28 }
  0x53   : > { %567 = vmatprep.subr.mxu0 %v859_v0  ;;  %v268_v9 = vld [vmem:[%s1027_s9 + $0x38] sm:$0xff]  ;;  %v267_v10 = vld [vmem:[%s1027_s9 + $0x30] sm:$0xff]  ;;  %v266_v11 = vld [vmem:[%s1027_s9 + $0x28] sm:$0xff]  ;;  %s416_s11 = sshll.u32 %s258_s10, 4  ;;  %s414_s21 = scalar_lea.hbm %s1094_s3, %s545_s4  ;;  %s417_s11 = int_to_ptr.vmem [resolvable:$true] %s416_s11 }
  0x54   : > { %568 = vmatpush3.msra.mxu0 %v275_v2  ;;  %v265_v12 = vld [vmem:[%s1027_s9 + $0x20] sm:$0xff]  ;;  %v264_v13 = vld [vmem:[%s1027_s9 + $0x18] sm:$0xff]  ;;  %v263_v14 = vld [vmem:[%s1027_s9 + $0x10] sm:$0xff]  ;;  %v392_v44 = vsub.s32 0, %v391_v40  ;;  %v397_v48 = vsub.s32 1, %v391_v40  ;;  %s403_s30 = scalar_lea.sflag [#allocation5], %s1024_s6 }
  0x55   : > { %569 = vmatprep.subr.mxu0 %v859_v0  ;;  %v262_v15 = vld [vmem:[%s1027_s9 + $0x8] sm:$0xff]  ;;  %v261_v16 = vld [vmem:[%s1027_s9] sm:$0xff]  ;;  %v260_v17 = vld [vmem:[#allocation3] sm:$0xff]  ;;  %s767_s27 = scalar_lea.vmem %s417_s11, 128  ;;  %p1109_p2 = scmp.ne.s32.totalorder %s1102_s25, 0 }
  0x56   : > { %570 = vmatpush3.msra.mxu0 %v274_v3  ;;  %v381_v41 = vld [vmem:[%s231_s23] sm:$0x3]  ;;  %p768_p10 = scmp.ne.s32.totalorder %s417_s11, %s767_s27  ;;  %s861_s1 = smov [#allocation9]  }
  0x57   : > { %571 = vmatprep.subr.mxu0 %v859_v0  ;;  %s771_s29 = sshll.u32 %s861_s1, 4  ;;  %s772_s29 = int_to_ptr.vmem [resolvable:$false] %s771_s29 }
  0x58   : > { %572 = vmatpush3.msra.mxu0 %v273_v4  ;;  %p769_p4 = pnand %p768_p10, %p1109_p2  ;;  %s773_s15 = scalar_lea.vmem %s772_s29, 256 }
  0x59   : > { %573 = vmatprep.subr.mxu0 %v859_v0  ;;  %p774_p0 = scmp.lt.s32.totalorder %s417_s11, %s772_s29  ;;  %p775_p8 = scmp.lt.s32.totalorder %s773_s15, %s767_s27 }
  0x5a   : > { %574 = vmatpush3.msra.mxu0 %v272_v5  ;;  %p770_p11 = pneg %p769_p4 }
  0x5b   : > { %575 = vmatprep.subr.mxu0 %v859_v0  ;;  %p776_p1 = por %p775_p8, %p774_p0 }
  0x5c   : > { %576 = vmatpush3.msra.mxu0 %v271_v6 }
  0x5d   : > { %577 = vmatprep.subr.mxu0 %v859_v0  ;;  %p777_p6 = pnand %p776_p1, %p770_p11 }
  0x5e   : > { %578 = vmatpush3.msra.mxu0 %v270_v7 }
  0x5f   : > { %579 = vmatprep.subr.mxu0 %v859_v0 }
  0x60   : > { %580 = vmatpush3.msra.mxu0 %v269_v8 }
  0x61   : > { %581 = vmatprep.subr.mxu0 %v859_v0 }
  0x62   : > { %582 = vmatpush3.msra.mxu0 %v268_v9 }
  0x63   : > { %583 = vmatprep.subr.mxu0 %v859_v0 }
  0x64   : > { %584 = vmatpush3.msra.mxu0 %v267_v10 }
  0x65   : > { %585 = vmatprep.subr.mxu0 %v859_v0 }
  0x66   : > { %586 = vmatpush3.msra.mxu0 %v266_v11 }
  0x67   : > { %587 = vmatprep.subr.mxu0 %v859_v0 }
  0x68   : > { %588 = vmatpush3.msra.mxu0 %v265_v12 }
  0x69   : > { %589 = vmatprep.subr.mxu0 %v859_v0 }
  0x6a   : > { %590 = vmatpush3.msra.mxu0 %v264_v13 }
  0x6b   : > { %591 = vmatprep.subr.mxu0 %v859_v0 }
  0x6c   : > { %592 = vmatpush3.msra.mxu0 %v263_v14 }
  0x6d   : > { %593 = vmatprep.subr.mxu0 %v859_v0 }
  0x6e   : > { %594 = vmatpush3.msra.mxu0 %v262_v15 }
  0x6f   : > { %595 = vmatprep.subr.mxu0 %v859_v0 }
  0x70   : > { %596 = vmatpush3.msra.mxu0 %v261_v16 }
  0x71   : > { %598 = vmatmul.mubr.f32.vlgmr.msra.gmra.mxu0 %v260_v17 }
 0x131   : > { %v343_v18 = vpop.f32.mrf.mxu0 }
 0x132   : > { %v363_v19 = vrot.slane %v343_v18, 4  ;;  %v369_v20 = vmul.f32 %v343_v18, %v343_v18 }
 0x133   : > { %v599_v21 = vpop.f32.mrf.mxu0 }
 0x134   : > { %v364_v22 = vadd.f32 %v363_v19, %v343_v18  ;;  %v370_v23 = vrot.slane %v369_v20, 4 }
 0x136   : > { %v365_v24 = vrot.slane %v364_v22, 2  ;;  %v371_v25 = vadd.f32 %v370_v23, %v369_v20 }
 0x138   : > { %v366_v26 = vadd.f32 %v365_v24, %v364_v22  ;;  %v372_v27 = vrot.slane %v371_v25, 2 }
 0x13a   : > { %v367_v28 = vrot.slane %v366_v26, 1  ;;  %v373_v29 = vadd.f32 %v372_v27, %v371_v25 }
 0x13c   : > { %v368_v30 = vadd.f32 %v367_v28, %v366_v26  ;;  %v374_v31 = vrot.slane %v373_v29, 1 }
 0x13e   : > { %v375_v32 = vadd.f32 %v374_v31, %v373_v29  ;;  %v376_v33 = vmul.f32 0.125, %v368_v30 }
 0x140   : > { %v377_v34 = vmul.f32 0.125, %v375_v32  ;;  %v378_v35 = vmul.f32 %v376_v33, %v376_v33 }
 0x142   : > { %v379_v36 = vsub.f32 %v377_v34, %v378_v35 }
 0x144   : > { %v380_v37 = vmax.f32 %v379_v36, 0.0 }
 0x146   : > { %v382_v38 = vadd.f32 1e-05, %v380_v37 }
 0x148   : > { %683 = vrsqrt.f32 %v382_v38 }
 0x155   : > { %v684_v42 = vpop.eup %683 }
 0x156   : > { %v384_v43 = vmul.f32 %v684_v42, %v381_v41 }
 0x158   : > { %v385_v45 = vmul.f32 %v384_v43, %v376_v33  ;;  %v393_v47 = vrot.slane %v384_v43, %v392_v44 }
 0x15a   : > { %v387_v46 = vrot.slane %v385_v45, 7  ;;  %v394_v50 = vmul.f32 %v393_v47, %v343_v18 }
 0x15c   : > { %v389_v49 = vsub.f32 %v381_v41, %v387_v46 }
 0x15e   : > { %v398_v51 = vrot.slane %v389_v49, %v397_v48 }
 0x160   : > { %v399_v52 = vadd.f32 %v398_v51, %v394_v50 }
 0x162   : > { %v400_v53 = vmax.f32 %v399_v52, 0.0 }
 0x164   : > { %401 = vst [vmem:[%s258_s10] sm:$0xff] %v400_v53 }
 0x165   : > { %780 = shalt.err (!%p777_p6)
}
 0x166   : > { %s781_s5 = scalar_lea.hbm %s414_s21, 128  ;;  %s785_s8 = scalar_lea.hbm %s1094_s3, 256 }
 0x167   : > { %p782_p9 = scmp.ne.s32.totalorder %s414_s21, %s781_s5  ;;  %p786_p7 = scmp.lt.s32.totalorder %s414_s21, %s1094_s3 }
 0x168   : > { %p787_p12 = scmp.lt.s32.totalorder %s785_s8, %s781_s5 }
 0x169   : > { %p783_p3 = pnand %p782_p9, %p1109_p2 }
 0x16a   : > { %p788_p5 = por %p787_p12, %p786_p7 }
 0x16b   : > { %p784_p13 = pneg %p783_p3 }
 0x16d   : > { %p789_p10 = pnand %p788_p5, %p784_p13 }
 0x16f   : > { %792 = shalt.err (!%p789_p10)
}
 0x170   : > { %608 = dma.vmem_to_hbm [thread:$0]  (%p1109_p2), %s417_s11, 128, %s414_s21, %s403_s30  }
 0x171 PF: > { %s428_s23 = sand.u32 1, %s831_s12   ;;  %p1110_p4 = scmp.ne.s32.totalorder %s1103_s26, 0 }
 0x172   : > { %p1111_p11 = scmp.ge.s32.totalorder %s851_s17, 2  ;;  %s429_s28 = scalar_lea.sflag [#allocation5], %s428_s23 }
 0x174   : > { %p622_p0 = pnand %p1111_p11, %p1110_p4 }
 0x176   : > { %p623_p8 = pneg %p622_p0 }
 0x178   : > { %826 = dma.done.wait (%p623_p8), %s429_s28, 128  }
 0x179   : > { %828 = vsyncadd (%p623_p8), %s429_s28, 4294967168  ;;  %s20_s17 = sadd.s32 1, %s851_s17   ;;  %s1112_s12 = smov %s835_s13 }
 0x17a   : > { %p17_p1 = scmp.ge.s32.totalorder %s20_s17, 4   ;;  %s1113_s13 = smov %s839_s14 }
 0x17b   : > { %s1114_s14 = smov %s930_s24  ;;  %s1115_s15 = smov %s847_s16 }
 0x17c   : > { %s1116_s16 = smov %s1118_s18  ;;  %19 = sbr.rel (!%p17_p1) target bundleno = 9 (0x9), region = 106 }
 0x181   :  { %434 = vsyncpa [#allocation4], 1 }
 0x182   :  { %436 = vsyncpa [#allocation4 + $0x1], 1 }
 0x183   :  { %437 = vsyncpa [#allocation7], 1 }
 0x184   :  { %439 = vsyncpa [#allocation7 + $0x1], 1 }
 0x185   :  { %440 = vsyncpa [#allocation5], 1 }
 0x186   :  { %442 = vsyncpa [#allocation5 + $0x1], 1 }

// kernel: tpu_custom_call.1
= control target key start
LH: loop header
LB: loop body
LE: loop exit
PB: predicated region body
PF: predicated region fallthrough
CT: control target
= control target key end

     0   :  { %s1091_s0 = inlined_call_operand.hbm [shape: f32[8,128], index: 0, kind: input, shape index: {}]   ;;  %s1092_s1 = inlined_call_operand.hbm [shape: f32[128,256], index: 1, kind: input, shape index: {}]   ;;  %s1093_s2 = inlined_call_operand.hbm [shape: f32[2,256], index: 2, kind: input, shape index: {}]   ;;  %s1094_s3 = inlined_call_operand.hbm [shape: f32[8,256], index: 3, kind: output, shape index: {}]  }
   0x1   :  { %1098 = sst [smem:[#allocation13_spill]] %s1092_s1 }
   0x2   :  { %8 = vsyncpa [#allocation4], 0 }
   0x3   :  { %9 = vsyncpa [#allocation7], 0 }
   0x4   :  { %11 = vsyncpa [#allocation7 + $0x1], 0 }
   0x5   :  { %12 = vsyncpa [#allocation5], 0 }
   0x6   :  { %14 = vsyncpa [#allocation5 + $0x1], 0  ;;  %s882_s12 = smov 0   ;;  %s884_s13 = smov 0  }
   0x7   :  { %s886_s14 = smov 0   ;;  %s888_s15 = smov 0  }
   0x8   :  { %s890_s16 = smov 0   ;;  %s892_s17 = smov 0  }
   0x9 LB: > { %s32_s18 = sadd.s32 1, %s847_s16  ;;  %s67_s19 = sadd.s32 1, %s839_s14  ;;  %s851_s17 = sphi %s892_s17, %s20_s17   ;;  %s847_s16 = sphi %s890_s16, %s1116_s16   ;;  %s843_s15 = sphi %s888_s15, %s1115_s15   ;;  %s839_s14 = sphi %s886_s14, %s1114_s14   ;;  %s835_s13 = sphi %s884_s13, %s1113_s13   ;;  %s831_s12 = sphi %s882_s12, %s1112_s12  }
   0xa   : > { %p34_p0 = scmp.ge.s32.totalorder %s32_s18, 2  ;;  %p74_p1 = scmp.ne.s32.totalorder %s839_s14, %s835_s13 }
   0xb   : > { %p75_p2 = scmp.eq.s32.totalorder %s851_s17, 0  ;;  %p626_p5 = scmp.lt.s32.totalorder %s851_s17, 2 }
   0xc   : > { %s1118_s18 = smov (%p34_p0, %s32_s18), 0  ;;  %s169_s21 = sand.u32 1, %s851_s17  }
   0xd   : > { %p76_p4 = por %p75_p2, %p74_p1  ;;  %s63_s20 = ssub.s32 %s847_s16, %s1118_s18 }
   0xe   : > { %p65_p6 = scmp.eq.s32.totalorder %s63_s20, 0  ;;  %s171_s22 = sand.u32 1, %s839_s14  }
   0xf   : > { %s536_s23 = sshll.u32 %s847_s16, 7  ;;  %s535_s25 = sshll.u32 %s171_s22, 7 }
  0x10   : > { %s930_s24 = scalar_select %p65_p6, %s839_s14, %s67_s19  }
  0x11   : > { %s1099_s1 = sld [smem:[#allocation13_spill]]  ;;  %p937_p7 = pnand %p626_p5, %p76_p4 }
  0x12   : > { %s173_s30 = scalar_lea.vmem [#allocation6], %s535_s25  ;;  %s941_s5 = scalar_lea.sflag [#allocation7], %s169_s21 }
  0x13   : > { %s182_s4 = sshll.u32 %s173_s30, 4  ;;  %p687_p8 = pneg %p937_p7  ;;  %s183_s4 = int_to_ptr.vmem [resolvable:$true] %s182_s4 }
  0x14   : > { %s698_s6 = scalar_lea.vmem %s183_s4, 2048  ;;  %s853_s7 = smov [#allocation6]  }
  0x15   : > { %p699_p9 = scmp.ne.s32.totalorder %s183_s4, %s698_s6  ;;  %s703_s8 = sshll.u32 %s853_s7, 4  ;;  %s704_s8 = int_to_ptr.vmem [resolvable:$false] %s703_s8 }
  0x16   : > { %s705_s9 = scalar_lea.vmem %s704_s8, 4096  ;;  %p706_p12 = scmp.lt.s32.totalorder %s183_s4, %s704_s8 }
  0x17   : > { %s181_s28 = scalar_lea.hbm %s1099_s1, %s536_s23  ;;  %p701_p10 = pnand %p699_p9, %p687_p8 }
  0x18   : > { %p707_p13 = scmp.lt.s32.totalorder %s705_s9, %s698_s6 }
  0x19   : > { %p702_p11 = pneg %p701_p10 }
  0x1a   : > { %p708_p0 = por %p707_p13, %p706_p12 }
  0x1c   : > { %p709_p2 = pnand %p708_p0, %p702_p11 }
  0x1e   : > { %712 = shalt.err (!%p709_p2)
}
  0x1f   : > { %s854_s10 = smov 256   ;;  %s855_s11 = smov 128  }
  0x20   : > { %s856_s19 = smov 8   ;;  %s952_s20 = sadd.s32 4294967295, %s851_s17  }
  0x21   : > { %617 = dma.hbm_to_vmem [thread:$0]  (!%p937_p7), %s181_s28, 2048, %s183_s4, %s941_s5, %s854_s10, %s855_s11, %s856_s19  }
  0x22   : > { %s531_s21 = sadd.s32 4294967294, %s851_s17   ;;  %p80_p4 = scmp.ne.s32.totalorder %s835_s13, %s831_s12 }
  0x23   : > { %p1096_p5 = scmp.eq.s32.totalorder %s952_s20, 0  ;;  %p130_p6 = scmp.eq.s32.totalorder %s952_s20, 1 }
  0x24   : > { %p136_p9 = scmp.eq.s32.totalorder %s531_s21, 1  ;;  %p532_p11 = scmp.ge.s32.totalorder %s851_s17, 1 }
  0x25   : > { %p961_p10 = por %p1096_p5, %p80_p4  ;;  %p969_p12 = por %p130_p6, %p74_p1 }
  0x26   : > { %p973_p13 = por %p136_p9, %p80_p4  ;;  %p143_p0 = scmp.lt.s32.totalorder %s851_s17, 3 }
  0x27   : > { %s1101_s23 = scalar_select %p961_p10, 1, 0 }
  0x28   : > { %s1102_s25 = scalar_select %p969_p12, 1, 0 }
  0x29   : > { %s1103_s26 = scalar_select %p973_p13, 1, 0 }
  0x2a   : > { %s537_s27 = sshll.u32 %s171_s22, 1  ;;  %p980_p2 = pnand %p532_p11, %p143_p0 }
  0x2b   : > { %s857_s30 = smov [#allocation3]   ;;  %s538_s6 = sshll.u32 %s847_s16, 5 }
  0x2c   : > { %s158_s4 = sshll.u32 %s857_s30, 4  ;;  %p610_p1 = pneg %p980_p2  ;;  %s984_s4 = int_to_ptr.vmem [resolvable:$true] %s158_s4 }
  0x2d   : > { %s201_s9 = scalar_lea.hbm %s1093_s2, %s538_s6  ;;  %s196_s10 = scalar_lea.vmem [#allocation8], %s537_s27 }
  0x2e   : > { %s203_s11 = sshll.u32 %s196_s10, 4  ;;  %p994_p4 = pnand %p610_p1, %p1096_p5  ;;  %s204_s11 = int_to_ptr.vmem [resolvable:$true] %s203_s11 }
  0x2f   : > { %s726_s19 = scalar_lea.vmem %s204_s11, 32  ;;  %s858_s21 = smov [#allocation8]  }
  0x30   : > { %p727_p6 = scmp.ne.s32.totalorder %s204_s11, %s726_s19  ;;  %s731_s30 = sshll.u32 %s858_s21, 4  ;;  %s732_s30 = int_to_ptr.vmem [resolvable:$false] %s731_s30 }
  0x31   : > { %s733_s1 = scalar_lea.vmem %s732_s30, 64  ;;  %p734_p0 = scmp.lt.s32.totalorder %s204_s11, %s732_s30 }
  0x32   : > { %p729_p9 = pnand %p727_p6, %p687_p8  ;;  %p735_p3 = scmp.lt.s32.totalorder %s733_s1, %s726_s19 }
  0x34   : > { %p730_p11 = pneg %p729_p9  ;;  %p736_p13 = por %p735_p3, %p734_p0 }
  0x36   : > { %p737_p12 = pnand %p736_p13, %p730_p11 }
  0x38   : > { %740 = shalt.err (!%p737_p12)
}
  0x39   : > { %620 = dma.hbm_to_vmem [thread:$0]  (!%p937_p7), %s201_s9, 32, %s204_s11, %s941_s5  }
  0x3a   : > { %p743_p8 = pneg %p994_p4  ;;  %s752_s27 = scalar_lea.vmem %s984_s4, 128 }
  0x3b   : > { %p753_p1 = scmp.ne.s32.totalorder %s984_s4, %s752_s27  ;;  %p760_p5 = scmp.lt.s32.totalorder %s984_s4, %s984_s4 }
  0x3c   : > { %p761_p10 = scmp.lt.s32.totalorder %s752_s27, %s752_s27 }
  0x3d   : > { %p755_p6 = pnand %p753_p1, %p743_p8 }
  0x3e   : > { %p762_p3 = por %p761_p10, %p760_p5 }
  0x3f   : > { %p756_p9 = pneg %p755_p6 }
  0x41   : > { %p763_p13 = pnand %p762_p3, %p756_p9 }
  0x43   : > { %766 = shalt.err (!%p763_p13)
}
  0x44   : > { %613 = dma.hbm_to_vmem [thread:$0]  (!%p994_p4), %s1091_s0, 128, %s984_s4, [#allocation4]  }
  0x45   : > { %212 = sbr.rel (%p980_p2) target bundleno = 369 (0x171), region = 32  ;;  %p1106_p7 = scmp.eq.s32.totalorder (!%p980_p2), %s952_s20, 0 }
  0x4a   : > { %818 = dma.done.wait (%p1106_p7), [#allocation4], 128   ;;  %p1107_p12 = pmov %p1106_p7 }
  0x4b   : > { %s218_s5 = sand.u32 1, %s952_s20   ;;  %s1024_s6 = sand.u32 1, %s835_s13  }
  0x4c   : > { %820 = vsyncadd (%p1107_p12), [#allocation4], 4294967168  ;;  %s541_s7 = sshll.u32 %s1024_s6, 7  ;;  %s219_s8 = scalar_lea.sflag [#allocation7], %s218_s5 }
  0x4d   : > { %s1027_s9 = scalar_lea.vmem [#allocation6], %s541_s7  ;;  %p1108_p5 = scmp.ne.s32.totalorder %s1101_s23, 0 }
  0x4f   : > { %822 = dma.done.wait (%p1108_p5), %s219_s8, 2080  }
  0x50   : > { %824 = vsyncadd (%p1108_p5), %s219_s8, 4294965216  ;;  %v859_v0 = vmov 0.0   ;;  %vm860_vm0 = vmmov 0   ;;  %v276_v1 = vld [vmem:[%s1027_s9 + $0x78] sm:$0xff]  ;;  %v275_v2 = vld [vmem:[%s1027_s9 + $0x70] sm:$0xff]  ;;  %s542_s20 = sshll.u32 %s1024_s6, 1  ;;  %v390_v39 = vlaneseq }
  0x51   : > { %565 = vmatprep.subr.mxu0 %v859_v0  ;;  %597 = vmatprep.mubr.msk.f32.mxu0 %vm860_vm0, %v859_v0  ;;  %v274_v3 = vld [vmem:[%s1027_s9 + $0x68] sm:$0xff]  ;;  %v273_v4 = vld [vmem:[%s1027_s9 + $0x60] sm:$0xff]  ;;  %v272_v5 = vld [vmem:[%s1027_s9 + $0x58] sm:$0xff]  ;;  %s231_s23 = scalar_lea.vmem [#allocation8], %s542_s20  ;;  %s543_s28 = sshll.u32 %s1024_s6, 3 }
  0x52   : > { %566 = vmatpush3.msra.mxu0 %v276_v1  ;;  %v271_v6 = vld [vmem:[%s1027_s9 + $0x50] sm:$0xff]  ;;  %v270_v7 = vld [vmem:[%s1027_s9 + $0x48] sm:$0xff]  ;;  %v269_v8 = vld [vmem:[%s1027_s9 + $0x40] sm:$0xff]  ;;  %v391_v40 = vshrl.u32 %v390_v39, 7  ;;  %s545_s4 = sshll.u32 %s843_s15, 7  ;;  %s258_s10 = scalar_lea.vmem [#allocation9], %s543_s28 }
  0x53   : > { %567 = vmatprep.subr.mxu0 %v859_v0  ;;  %v268_v9 = vld [vmem:[%s1027_s9 + $0x38] sm:$0xff]  ;;  %v267_v10 = vld [vmem:[%s1027_s9 + $0x30] sm:$0xff]  ;;  %v266_v11 = vld [vmem:[%s1027_s9 + $0x28] sm:$0xff]  ;;  %s416_s11 = sshll.u32 %s258_s10, 4  ;;  %s414_s21 = scalar_lea.hbm %s1094_s3, %s545_s4  ;;  %s417_s11 = int_to_ptr.vmem [resolvable:$true] %s416_s11 }
  0x54   : > { %568 = vmatpush3.msra.mxu0 %v275_v2  ;;  %v265_v12 = vld [vmem:[%s1027_s9 + $0x20] sm:$0xff]  ;;  %v264_v13 = vld [vmem:[%s1027_s9 + $0x18] sm:$0xff]  ;;  %v263_v14 = vld [vmem:[%s1027_s9 + $0x10] sm:$0xff]  ;;  %v392_v44 = vsub.s32 0, %v391_v40  ;;  %v397_v48 = vsub.s32 1, %v391_v40  ;;  %s403_s30 = scalar_lea.sflag [#allocation5], %s1024_s6 }
  0x55   : > { %569 = vmatprep.subr.mxu0 %v859_v0  ;;  %v262_v15 = vld [vmem:[%s1027_s9 + $0x8] sm:$0xff]  ;;  %v261_v16 = vld [vmem:[%s1027_s9] sm:$0xff]  ;;  %v260_v17 = vld [vmem:[#allocation3] sm:$0xff]  ;;  %s767_s27 = scalar_lea.vmem %s417_s11, 128  ;;  %p1109_p2 = scmp.ne.s32.totalorder %s1102_s25, 0 }
  0x56   : > { %570 = vmatpush3.msra.mxu0 %v274_v3  ;;  %v381_v41 = vld [vmem:[%s231_s23] sm:$0x3]  ;;  %p768_p10 = scmp.ne.s32.totalorder %s417_s11, %s767_s27  ;;  %s861_s1 = smov [#allocation9]  }
  0x57   : > { %571 = vmatprep.subr.mxu0 %v859_v0  ;;  %s771_s29 = sshll.u32 %s861_s1, 4  ;;  %s772_s29 = int_to_ptr.vmem [resolvable:$false] %s771_s29 }
  0x58   : > { %572 = vmatpush3.msra.mxu0 %v273_v4  ;;  %p769_p4 = pnand %p768_p10, %p1109_p2  ;;  %s773_s15 = scalar_lea.vmem %s772_s29, 256 }
  0x59   : > { %573 = vmatprep.subr.mxu0 %v859_v0  ;;  %p774_p0 = scmp.lt.s32.totalorder %s417_s11, %s772_s29  ;;  %p775_p8 = scmp.lt.s32.totalorder %s773_s15, %s767_s27 }
  0x5a   : > { %574 = vmatpush3.msra.mxu0 %v272_v5  ;;  %p770_p11 = pneg %p769_p4 }
  0x5b   : > { %575 = vmatprep.subr.mxu0 %v859_v0  ;;  %p776_p1 = por %p775_p8, %p774_p0 }
  0x5c   : > { %576 = vmatpush3.msra.mxu0 %v271_v6 }
  0x5d   : > { %577 = vmatprep.subr.mxu0 %v859_v0  ;;  %p777_p6 = pnand %p776_p1, %p770_p11 }
  0x5e   : > { %578 = vmatpush3.msra.mxu0 %v270_v7 }
  0x5f   : > { %579 = vmatprep.subr.mxu0 %v859_v0 }
  0x60   : > { %580 = vmatpush3.msra.mxu0 %v269_v8 }
  0x61   : > { %581 = vmatprep.subr.mxu0 %v859_v0 }
  0x62   : > { %582 = vmatpush3.msra.mxu0 %v268_v9 }
  0x63   : > { %583 = vmatprep.subr.mxu0 %v859_v0 }
  0x64   : > { %584 = vmatpush3.msra.mxu0 %v267_v10 }
  0x65   : > { %585 = vmatprep.subr.mxu0 %v859_v0 }
  0x66   : > { %586 = vmatpush3.msra.mxu0 %v266_v11 }
  0x67   : > { %587 = vmatprep.subr.mxu0 %v859_v0 }
  0x68   : > { %588 = vmatpush3.msra.mxu0 %v265_v12 }
  0x69   : > { %589 = vmatprep.subr.mxu0 %v859_v0 }
  0x6a   : > { %590 = vmatpush3.msra.mxu0 %v264_v13 }
  0x6b   : > { %591 = vmatprep.subr.mxu0 %v859_v0 }
  0x6c   : > { %592 = vmatpush3.msra.mxu0 %v263_v14 }
  0x6d   : > { %593 = vmatprep.subr.mxu0 %v859_v0 }
  0x6e   : > { %594 = vmatpush3.msra.mxu0 %v262_v15 }
  0x6f   : > { %595 = vmatprep.subr.mxu0 %v859_v0 }
  0x70   : > { %596 = vmatpush3.msra.mxu0 %v261_v16 }
  0x71   : > { %598 = vmatmul.mubr.f32.vlgmr.msra.gmra.mxu0 %v260_v17 }
 0x131   : > { %v343_v18 = vpop.f32.mrf.mxu0 }
 0x132   : > { %v363_v19 = vrot.slane %v343_v18, 4  ;;  %v369_v20 = vmul.f32 %v343_v18, %v343_v18 }
 0x133   : > { %v599_v21 = vpop.f32.mrf.mxu0 }
 0x134   : > { %v364_v22 = vadd.f32 %v363_v19, %v343_v18  ;;  %v370_v23 = vrot.slane %v369_v20, 4 }
 0x136   : > { %v365_v24 = vrot.slane %v364_v22, 2  ;;  %v371_v25 = vadd.f32 %v370_v23, %v369_v20 }
 0x138   : > { %v366_v26 = vadd.f32 %v365_v24, %v364_v22  ;;  %v372_v27 = vrot.slane %v371_v25, 2 }
 0x13a   : > { %v367_v28 = vrot.slane %v366_v26, 1  ;;  %v373_v29 = vadd.f32 %v372_v27, %v371_v25 }
 0x13c   : > { %v368_v30 = vadd.f32 %v367_v28, %v366_v26  ;;  %v374_v31 = vrot.slane %v373_v29, 1 }
 0x13e   : > { %v375_v32 = vadd.f32 %v374_v31, %v373_v29  ;;  %v376_v33 = vmul.f32 0.125, %v368_v30 }
 0x140   : > { %v377_v34 = vmul.f32 0.125, %v375_v32  ;;  %v378_v35 = vmul.f32 %v376_v33, %v376_v33 }
 0x142   : > { %v379_v36 = vsub.f32 %v377_v34, %v378_v35 }
 0x144   : > { %v380_v37 = vmax.f32 %v379_v36, 0.0 }
 0x146   : > { %v382_v38 = vadd.f32 1e-05, %v380_v37 }
 0x148   : > { %683 = vrsqrt.f32 %v382_v38 }
 0x155   : > { %v684_v42 = vpop.eup %683 }
 0x156   : > { %v384_v43 = vmul.f32 %v684_v42, %v381_v41 }
 0x158   : > { %v385_v45 = vmul.f32 %v384_v43, %v376_v33  ;;  %v393_v47 = vrot.slane %v384_v43, %v392_v44 }
 0x15a   : > { %v387_v46 = vrot.slane %v385_v45, 7  ;;  %v394_v50 = vmul.f32 %v393_v47, %v343_v18 }
 0x15c   : > { %v389_v49 = vsub.f32 %v381_v41, %v387_v46 }
 0x15e   : > { %v398_v51 = vrot.slane %v389_v49, %v397_v48 }
 0x160   : > { %v399_v52 = vadd.f32 %v398_v51, %v394_v50 }
 0x162   : > { %v400_v53 = vmax.f32 %v399_v52, 0.0 }
 0x164   : > { %401 = vst [vmem:[%s258_s10] sm:$0xff] %v400_v53 }
 0x165   : > { %780 = shalt.err (!%p777_p6)
}
 0x166   : > { %s781_s5 = scalar_lea.hbm %s414_s21, 128  ;;  %s785_s8 = scalar_lea.hbm %s1094_s3, 256 }
 0x167   : > { %p782_p9 = scmp.ne.s32.totalorder %s414_s21, %s781_s5  ;;  %p786_p7 = scmp.lt.s32.totalorder %s414_s21, %s1094_s3 }
 0x168   : > { %p787_p12 = scmp.lt.s32.totalorder %s785_s8, %s781_s5 }
 0x169   : > { %p783_p3 = pnand %p782_p9, %p1109_p2 }
 0x16a   : > { %p788_p5 = por %p787_p12, %p786_p7 }
 0x16b   : > { %p784_p13 = pneg %p783_p3 }
 0x16d   : > { %p789_p10 = pnand %p788_p5, %p784_p13 }
 0x16f   : > { %792 = shalt.err (!%p789_p10)
}
 0x170   : > { %608 = dma.vmem_to_hbm [thread:$0]  (%p1109_p2), %s417_s11, 128, %s414_s21, %s403_s30  }
 0x171 PF: > { %s428_s23 = sand.u32 1, %s831_s12   ;;  %p1110_p4 = scmp.ne.s32.totalorder %s1103_s26, 0 }
 0x172   : > { %p1111_p11 = scmp.ge.s32.totalorder %s851_s17, 2  ;;  %s429_s28 = scalar_lea.sflag [#allocation5], %s428_s23 }
 0x174   : > { %p622_p0 = pnand %p1111_p11, %p1110_p4 }
 0x176   : > { %p623_p8 = pneg %p622_p0 }
 0x178   : > { %826 = dma.done.wait (%p623_p8), %s429_s28, 128  }
 0x179   : > { %828 = vsyncadd (%p623_p8), %s429_s28, 4294967168  ;;  %s20_s17 = sadd.s32 1, %s851_s17   ;;  %s1112_s12 = smov %s835_s13 }
 0x17a   : > { %p17_p1 = scmp.ge.s32.totalorder %s20_s17, 4   ;;  %s1113_s13 = smov %s839_s14 }
 0x17b   : > { %s1114_s14 = smov %s930_s24  ;;  %s1115_s15 = smov %s847_s16 }
 0x17c   : > { %s1116_s16 = smov %s1118_s18  ;;  %19 = sbr.rel (!%p17_p1) target bundleno = 9 (0x9), region = 106 }
 0x181   :  { %434 = vsyncpa [#allocation4], 1 }
 0x182   :  { %436 = vsyncpa [#allocation4 + $0x1], 1 }
 0x183   :  { %437 = vsyncpa [#allocation7], 1 }
 0x184   :  { %439 = vsyncpa [#allocation7 + $0x1], 1 }
 0x185   :  { %440 = vsyncpa [#allocation5], 1 }
 0x186   :  { %442 = vsyncpa [#allocation5 + $0x1], 1 }

</bundles_post_ra>
